<compile_context>
chip_gen: v5e
topology: v5e:2x2
jax: 0.10.0
libtpu: 0.0.40
codegen_flags: <defaults>
</compile_context>

<pallas_src>
import jax
import jax.numpy as jnp
from jax.experimental import pallas as pl
from jax.experimental.pallas import tpu as pltpu

N_FEATURES = 4      # CartPole observation dim
HIDDEN = 20
OUT = 1


def critic_kernel(x_ref, w1t_ref, b1t_ref, w2t_ref, b2_ref, o_ref):
    """One batch tile, batch on lanes.

    x_ref  : (N_FEATURES, TB)   activations, lane-dense
    w1t_ref: (HIDDEN, N_FEATURES)
    b1t_ref: (HIDDEN, 1)
    w2t_ref: (HIDDEN, 1)
    b2_ref : (1,)  in SMEM
    o_ref  : (1, TB)            lane-dense output
    """
    tb = o_ref.shape[-1]
    x = x_ref[...].astype(jnp.float32)                      # (N_FEATURES, TB)
    w1t = w1t_ref[...].astype(jnp.float32)                  # (HIDDEN, N_FEATURES)

    # Hoist the lane-broadcasts of the tiny loop-invariant weight columns once
    # per grid step (outside the k accumulation loop).
    w_cols = [jnp.broadcast_to(w1t[:, k:k + 1], (HIDDEN, tb))
              for k in range(N_FEATURES)]
    w2_b = jnp.broadcast_to(w2t_ref[...].astype(jnp.float32), (HIDDEN, tb))

    # ---- layer 1: h[j, b] = b1[j] + sum_k w1[k, j] * x[k, b]  (VPU, no MXU) --
    h = jnp.broadcast_to(b1t_ref[...].astype(jnp.float32), (HIDDEN, tb))
    for k in range(N_FEATURES):                              # static unroll (4)
        h = h + w_cols[k] * x[k:k + 1, :]
    h = jnp.maximum(h, 0.0)                                  # ReLU (HIDDEN, TB)

    # ---- layer 2: out[b] = sum_j w2[j] * h[j, b] + b2  (sublane reduce) -----
    out = jnp.sum(h * w2_b, axis=0, keepdims=True) + b2_ref[0]   # (1, TB)
    o_ref[...] = out.astype(o_ref.dtype)


def critic_forward(x, w1, b1, w2, b2, *, batch_tile=32768):
    """Critic forward pass; returns (batch, 1) like the PyTorch module.

    batch <= batch_tile : single grid-free block.
    batch  > batch_tile : cdiv-tiled grid over the batch (lane) axis, weights
                          VMEM-resident, batch axis "parallel" (v7x 2-TC).
    """
    batch = x.shape[0]
    # Lane alignment of the block shape (array itself needs no alignment).
    batch_tile = max(128, (batch_tile // 128) * 128)

    # Lane-dense layout: batch on lanes.  The wrapper-side transpose is layout
    # plumbing; callers that already hold (N_FEATURES, B) activations can pass
    # them straight through instead.
    xt = jnp.transpose(x)                                         # (4, batch)
    w1t = jnp.asarray(w1, jnp.float32).reshape(N_FEATURES, HIDDEN).T  # (20, 4)
    b1t = jnp.asarray(b1, jnp.float32).reshape(HIDDEN, 1)
    w2t = jnp.asarray(w2, jnp.float32).reshape(HIDDEN, 1)
    b2s = jnp.asarray(b2, jnp.float32).reshape(1)

    if batch > batch_tile:
        grid = (pl.cdiv(batch, batch_tile),)
        out = pl.pallas_call(
            critic_kernel,
            out_shape=jax.ShapeDtypeStruct((1, batch), jnp.float32),
            grid=grid,
            in_specs=[
                pl.BlockSpec((N_FEATURES, batch_tile), lambda i: (0, i)),
                pl.BlockSpec((HIDDEN, N_FEATURES), lambda i: (0, 0)),
                pl.BlockSpec((HIDDEN, 1), lambda i: (0, 0)),
                pl.BlockSpec((HIDDEN, 1), lambda i: (0, 0)),
                pl.BlockSpec(memory_space=pltpu.MemorySpace.SMEM),
            ],
            out_specs=pl.BlockSpec((1, batch_tile), lambda i: (0, i)),
            compiler_params=pltpu.CompilerParams(
                dimension_semantics=("parallel",),
                vmem_limit_bytes=32 * 1024 * 1024),
        )(xt, w1t, b1t, w2t, b2s)
    else:
        # Small batch: one full-array block, no grid, no pipeline bookkeeping.
        out = pl.pallas_call(
            critic_kernel,
            out_shape=jax.ShapeDtypeStruct((1, batch), jnp.float32),
            in_specs=[
                pl.BlockSpec(memory_space=pltpu.MemorySpace.VMEM),
                pl.BlockSpec(memory_space=pltpu.MemorySpace.VMEM),
                pl.BlockSpec(memory_space=pltpu.MemorySpace.VMEM),
                pl.BlockSpec(memory_space=pltpu.MemorySpace.VMEM),
                pl.BlockSpec(memory_space=pltpu.MemorySpace.SMEM),
            ],
            out_specs=pl.BlockSpec(memory_space=pltpu.MemorySpace.VMEM),
        )(xt, w1t, b1t, w2t, b2s)

    # Back to the PyTorch (batch, 1) shape.
    return out.reshape(batch, OUT)


def init_params(key):
    """Deterministic init mirroring nn.Linear default (uniform +-1/sqrt(fan_in))."""
    k1, k2, k3, k4 = jax.random.split(key, 4)
    bound1 = 1.0 / jnp.sqrt(N_FEATURES)
    bound2 = 1.0 / jnp.sqrt(HIDDEN)
    w1 = jax.random.uniform(k1, (N_FEATURES, HIDDEN), jnp.float32, -bound1, bound1)
    b1 = jax.random.uniform(k2, (1, HIDDEN), jnp.float32, -bound1, bound1)
    w2 = jax.random.uniform(k3, (1, HIDDEN), jnp.float32, -bound2, bound2)
    b2 = jax.random.uniform(k4, (1, 1), jnp.float32, -bound2, bound2)
    return w1, b1, w2, b2


def _reference(x, w1, b1, w2, b2):
    return jnp.maximum(x @ w1 + b1, 0.0) @ w2.reshape(1, HIDDEN).T + b2.reshape(1, 1)


if __name__ == "__main__":
    key = jax.random.PRNGKey(0)
    kx, kp, kb = jax.random.split(key, 3)
    w1, b1, w2, b2 = init_params(kp)

    # --- small batch: single-block, grid-free path ---------------------------
    batch = 8
    x = jax.random.normal(kx, (batch, N_FEATURES), jnp.float32)
    out = critic_forward(x, w1, b1, w2, b2)
    jax.block_until_ready(out)
    ref = _reference(x, w1, b1, w2, b2)
    assert out.shape == (batch, OUT)
    assert jnp.allclose(out, ref, atol=1e-5, rtol=1e-5)

    # --- larger, NON-multiple batch: cdiv-tiled "parallel" grid path ---------
    # (small tile here just to exercise the grid + partial-last-block path;
    #  the production default is batch_tile=32768)
    big = 1000
    xb = jax.random.normal(kb, (big, N_FEATURES), jnp.float32)
    outb = critic_forward(xb, w1, b1, w2, b2, batch_tile=256)
    jax.block_until_ready(outb)
    refb = _reference(xb, w1, b1, w2, b2)
    assert outb.shape == (big, OUT)
    assert jnp.allclose(outb, refb, atol=1e-5, rtol=1e-5)

    print("KERNEL_OK")
</pallas_src>

<mosaic_0001>
module attributes {stable_mosaic.version = 11 : i64} {
  func.func @critic_kernel(%arg0: memref<4x8xf32, #tpu.memory_space<vmem>>, %arg1: memref<20x4xf32, #tpu.memory_space<vmem>>, %arg2: memref<20x1xf32, #tpu.memory_space<vmem>>, %arg3: memref<20x1xf32, #tpu.memory_space<vmem>>, %arg4: memref<1xf32, #tpu.memory_space<smem>>, %arg5: memref<1x8xf32, #tpu.memory_space<vmem>>) attributes {dimension_semantics = [], scalar_prefetch = 0 : i64, scratch_operands = 0 : i64, tpu.core_type = #tpu.core_type<tc>} {
    %c0 = arith.constant 0 : index
    %c0_0 = arith.constant 0 : index
    %0 = vector.load %arg0[%c0, %c0_0] : memref<4x8xf32, #tpu.memory_space<vmem>>, vector<4x8xf32>
    %c0_1 = arith.constant 0 : index
    %c0_2 = arith.constant 0 : index
    %1 = vector.load %arg1[%c0_1, %c0_2] : memref<20x4xf32, #tpu.memory_space<vmem>>, vector<20x4xf32>
    %2 = vector.extract_strided_slice %1 {offsets = [0, 0], sizes = [20, 1], strides = [1, 1]} : vector<20x4xf32> to vector<20x1xf32>
    %3 = vector.shape_cast %2 : vector<20x1xf32> to vector<20x1xf32>
    %4 = vector.broadcast %3 : vector<20x1xf32> to vector<20x8xf32>
    %5 = vector.extract_strided_slice %1 {offsets = [0, 1], sizes = [20, 1], strides = [1, 1]} : vector<20x4xf32> to vector<20x1xf32>
    %6 = vector.shape_cast %5 : vector<20x1xf32> to vector<20x1xf32>
    %7 = vector.broadcast %6 : vector<20x1xf32> to vector<20x8xf32>
    %8 = vector.extract_strided_slice %1 {offsets = [0, 2], sizes = [20, 1], strides = [1, 1]} : vector<20x4xf32> to vector<20x1xf32>
    %9 = vector.shape_cast %8 : vector<20x1xf32> to vector<20x1xf32>
    %10 = vector.broadcast %9 : vector<20x1xf32> to vector<20x8xf32>
    %11 = vector.extract_strided_slice %1 {offsets = [0, 3], sizes = [20, 1], strides = [1, 1]} : vector<20x4xf32> to vector<20x1xf32>
    %12 = vector.shape_cast %11 : vector<20x1xf32> to vector<20x1xf32>
    %13 = vector.broadcast %12 : vector<20x1xf32> to vector<20x8xf32>
    %c0_3 = arith.constant 0 : index
    %c0_4 = arith.constant 0 : index
    %14 = vector.load %arg3[%c0_3, %c0_4] : memref<20x1xf32, #tpu.memory_space<vmem>>, vector<20x1xf32>
    %15 = vector.shape_cast %14 : vector<20x1xf32> to vector<20x1xf32>
    %16 = vector.broadcast %15 : vector<20x1xf32> to vector<20x8xf32>
    %c0_5 = arith.constant 0 : index
    %c0_6 = arith.constant 0 : index
    %17 = vector.load %arg2[%c0_5, %c0_6] : memref<20x1xf32, #tpu.memory_space<vmem>>, vector<20x1xf32>
    %18 = vector.shape_cast %17 : vector<20x1xf32> to vector<20x1xf32>
    %19 = vector.broadcast %18 : vector<20x1xf32> to vector<20x8xf32>
    %20 = vector.extract_strided_slice %0 {offsets = [0, 0], sizes = [1, 8], strides = [1, 1]} : vector<4x8xf32> to vector<1x8xf32>
    %21 = vector.broadcast %20 : vector<1x8xf32> to vector<20x8xf32>
    %22 = arith.mulf %4, %21 : vector<20x8xf32>
    %23 = arith.addf %19, %22 : vector<20x8xf32>
    %24 = vector.extract_strided_slice %0 {offsets = [1, 0], sizes = [1, 8], strides = [1, 1]} : vector<4x8xf32> to vector<1x8xf32>
    %25 = vector.broadcast %24 : vector<1x8xf32> to vector<20x8xf32>
    %26 = arith.mulf %7, %25 : vector<20x8xf32>
    %27 = arith.addf %23, %26 : vector<20x8xf32>
    %28 = vector.extract_strided_slice %0 {offsets = [2, 0], sizes = [1, 8], strides = [1, 1]} : vector<4x8xf32> to vector<1x8xf32>
    %29 = vector.broadcast %28 : vector<1x8xf32> to vector<20x8xf32>
    %30 = arith.mulf %10, %29 : vector<20x8xf32>
    %31 = arith.addf %27, %30 : vector<20x8xf32>
    %32 = vector.extract_strided_slice %0 {offsets = [3, 0], sizes = [1, 8], strides = [1, 1]} : vector<4x8xf32> to vector<1x8xf32>
    %33 = vector.broadcast %32 : vector<1x8xf32> to vector<20x8xf32>
    %34 = arith.mulf %13, %33 : vector<20x8xf32>
    %35 = arith.addf %31, %34 : vector<20x8xf32>
    %cst = arith.constant 0.000000e+00 : f32
    %36 = vector.broadcast %cst : f32 to vector<20x8xf32>
    %37 = arith.maximumf %35, %36 : vector<20x8xf32>
    %38 = arith.mulf %37, %16 : vector<20x8xf32>
    %cst_7 = arith.constant dense<0.000000e+00> : vector<8xf32>
    %39 = vector.multi_reduction <add>, %38, %cst_7 [0] : vector<20x8xf32> to vector<8xf32>
    %40 = vector.shape_cast %39 : vector<8xf32> to vector<1x8xf32>
    %c0_8 = arith.constant 0 : index
    %41 = memref.load %arg4[%c0_8] : memref<1xf32, #tpu.memory_space<smem>>
    %42 = vector.broadcast %41 : f32 to vector<1x8xf32>
    %43 = arith.addf %40, %42 : vector<1x8xf32>
    %c0_9 = arith.constant 0 : index
    %c0_10 = arith.constant 0 : index
    %44 = vector.load %arg5[%c0_9, %c0_10] : memref<1x8xf32, #tpu.memory_space<vmem>>, vector<1x8xf32>
    tpu.vector_store %arg5[%c0_9, %c0_10], %43 {strides = array<i32>} : memref<1x8xf32, #tpu.memory_space<vmem>>, vector<1x8xf32>,
    return
  }
}

</mosaic_0001>

<bundles_post_ra>
// kernel: tpu_custom_call.1
= control target key start
LH: loop header
LB: loop body
LE: loop exit
PB: predicated region body
PF: predicated region fallthrough
CT: control target
= control target key end

     0   :  { %v226_v3 = vmov 0   ;;  %v227_v4 = vmov 1   ;;  %s297_s0 = inlined_call_operand.vmem [shape: f32[4,8], index: 0, kind: input, shape index: {}]   ;;  %s298_s1 = inlined_call_operand.vmem [shape: f32[20,4], index: 1, kind: input, shape index: {}]   ;;  %s299_s2 = inlined_call_operand.vmem [shape: f32[20,1], index: 2, kind: input, shape index: {}]   ;;  %s300_s3 = inlined_call_operand.vmem [shape: f32[20,1], index: 3, kind: input, shape index: {}]   ;;  %s301_s4 = inlined_call_operand.<no memory space> [shape: f32[1], index: 4, kind: input, shape index: {}]   ;;  %s302_s5 = inlined_call_operand.hbm [shape: f32[1,8], index: 5, kind: output, shape index: {}]  }
   0x1   :  { %v25_v0 = vld [vmem:[%s298_s1 + $0x10] sm:$0xf]  ;;  %v23_v1 = vld [vmem:[%s298_s1] sm:$0xff]  ;;  %v24_v2 = vld [vmem:[%s298_s1 + $0x8] sm:$0xff]  ;;  %187 = vset.pattern.permute.xlu1 %v226_v3  ;;  %186 = vset.pattern.permute.xlu0 %v226_v3 }
   0x2   :  { %189 = vset.pattern.permute.xlu2 %v227_v4  ;;  %38 = vperm.xlu1 %187, %v25_v0  }
   0x3   :  { %11 = vsyncpa [#allocation4], 0  ;;  %28 = vperm.xlu0 %186, %v23_v1   ;;  %46 = vperm.xlu2 %189, %v24_v2   ;;  %v96_v5 = vld [vmem:[%s299_s2 + $0x8] sm:$0xff]  ;;  %v95_v6 = vld [vmem:[%s299_s2] sm:$0xff]  ;;  %v228_v7 = vmov 2   ;;  %v229_v9 = vmov 3  }
   0x4   :  { %v97_v8 = vld [vmem:[%s299_s2 + $0x10] sm:$0xf]  ;;  %v78_v10 = vld [vmem:[%s300_s3 + $0x8] sm:$0xff]  ;;  %v77_v11 = vld [vmem:[%s300_s3] sm:$0xff]  ;;  %vm147_vm0 = vcmask 64512   ;;  %vm151_vm1 = vcmask 60416  }
   0x5   :  { %v79_v12 = vld [vmem:[%s300_s3 + $0x10] sm:$0xf]  ;;  %v22_v22 = vld [vmem:[%s297_s0] sm:$0xf]  ;;  %s230_s11 = smov [#allocation3]   ;;  %s172_s15 = sshll.u32 %s302_s5, 4  ;;  %s173_s15 = int_to_ptr.hbm [resolvable:$true] %s172_s15 }
   0x6   :  { %v113_v23 = vperm.slane %v22_v22, 0  ;;  %v120_v29 = vperm.slane %v22_v22, 1  ;;  %v127_v31 = vperm.slane %v22_v22, 2  ;;  %v134_v35 = vperm.slane %v22_v22, 3  ;;  %s170_s12 = sshll.u32 %s230_s11, 4  ;;  %s171_s12 = int_to_ptr.vmem [resolvable:$true] %s170_s12 }
   0x7   :  { %vm163_vm2 = vcmask 57344  }
   0xa   :  { %188 = vset.pattern.permute.xlu1 %v227_v4 }
   0xb   :  { %33 = vperm.xlu0 %186, %v24_v2   ;;  %50 = vperm.xlu2 %189, %v25_v0  }
   0xc   :  { %42 = vperm.xlu1 %188, %v23_v1  }
  0x13   :  { %190 = vset.pattern.permute.xlu0 %v228_v7  ;;  %192 = vset.pattern.permute.xlu2 %v226_v3 }
  0x14   :  { %191 = vset.pattern.permute.xlu1 %v226_v3  ;;  %54 = vperm.xlu0 %190, %v23_v1  }
  0x15   :  { %105 = vperm.xlu2 %192, %v96_v5   ;;  %100 = vperm.xlu1 %191, %v95_v6  }
  0x1c   :  { %62 = vperm.xlu0 %190, %v25_v0  }
  0x1d   :  { %110 = vperm.xlu2 %192, %v97_v8   ;;  %193 = vset.pattern.permute.xlu1 %v228_v7 }
  0x1e   :  { %58 = vperm.xlu1 %193, %v24_v2  }
  0x24   :  { %196 = vset.pattern.permute.xlu0 %v229_v9 }
  0x25   :  { %74 = vperm.xlu0 %196, %v25_v0   ;;  %195 = vset.pattern.permute.xlu2 %v229_v9 }
  0x26   :  { %194 = vset.pattern.permute.xlu1 %v229_v9  ;;  %70 = vperm.xlu2 %195, %v24_v2  }
  0x27   :  { %66 = vperm.xlu1 %194, %v23_v1  }
  0x2d   :  { %199 = vset.pattern.permute.xlu0 %v226_v3 }
  0x2e   :  { %198 = vset.pattern.permute.xlu2 %v226_v3 }
  0x2f   :  { %197 = vset.pattern.permute.xlu1 %v226_v3  ;;  %87 = vperm.xlu2 %198, %v78_v10  }
  0x30   :  { %82 = vperm.xlu1 %197, %v77_v11  }
  0x38   :  { %92 = vperm.xlu1 %197, %v79_v12   ;;  %v161_v12 = vstv %s301_s4 }
  0x5d   :  { %v47_v13 = vpop.permute.xlu2 %46 }
  0x5e   :  { %v122_v33 = vmul.f32 %v120_v29, %v47_v13 }
  0x65   :  { %v51_v16 = vpop.permute.xlu2 %50 }
  0x66   :  { %v123_v46 = vmul.f32 %v120_v29, %v51_v16 }
  0x6f   :  { %v106_v20 = vpop.permute.xlu2 %105 }
  0x74   :  { %v39_v14 = vpop.permute.xlu1 %38 }
  0x75   :  { %v29_v15 = vpop.permute.xlu0 %28  ;;  %v116_v37 = vmul.f32 %v113_v23, %v39_v14 }
  0x76   :  { %v114_v27 = vmul.f32 %v113_v23, %v29_v15 }
  0x77   :  { %v111_v26 = vpop.permute.xlu2 %110 }
  0x78   :  { %v119_v47 = vadd.f32 %v116_v37, %v111_v26 }
  0x7a   :  { %v126_v53 = vadd.f32 %v123_v46, %v119_v47 }
  0x7d   :  { %v34_v18 = vpop.permute.xlu0 %33 }
  0x7e   :  { %v43_v17 = vpop.permute.xlu1 %42  ;;  %v115_v25 = vmul.f32 %v113_v23, %v34_v18 }
  0x7f   :  { %v121_v34 = vmul.f32 %v120_v29, %v43_v17 }
  0x80   :  { %v118_v30 = vadd.f32 %v115_v25, %v106_v20  ;;  %v71_v42 = vpop.permute.xlu2 %70 }
  0x81   :  { %v136_v43 = vmul.f32 %v134_v35, %v71_v42 }
  0x82   :  { %v125_v40 = vadd.f32 %v122_v33, %v118_v30 }
  0x86   :  { %v55_v21 = vpop.permute.xlu0 %54 }
  0x87   :  { %v101_v19 = vpop.permute.xlu1 %100  ;;  %v128_v38 = vmul.f32 %v127_v31, %v55_v21 }
  0x88   :  { %v117_v32 = vadd.f32 %v114_v27, %v101_v19 }
  0x89   :  { %v88_v59 = vpop.permute.xlu2 %87 }
  0x8a   :  { %v124_v39 = vadd.f32 %v121_v34, %v117_v32 }
  0x8c   :  { %v131_v48 = vadd.f32 %v128_v38, %v124_v39 }
  0x8e   :  { %v63_v28 = vpop.permute.xlu0 %62 }
  0x8f   :  { %v130_v50 = vmul.f32 %v127_v31, %v63_v28 }
  0x90   :  { %v59_v24 = vpop.permute.xlu1 %58 }
  0x91   :  { %v129_v36 = vmul.f32 %v127_v31, %v59_v24  ;;  %v133_v56 = vadd.f32 %v130_v50, %v126_v53 }
  0x93   :  { %v132_v44 = vadd.f32 %v129_v36, %v125_v40 }
  0x95   :  { %v139_v51 = vadd.f32 %v136_v43, %v132_v44 }
  0x97   :  { %v75_v49 = vpop.permute.xlu0 %74  ;;  %v142_v57 = vmax.f32 %v139_v51, 0.0 }
  0x98   :  { %v137_v54 = vmul.f32 %v134_v35, %v75_v49 }
  0x99   :  { %v67_v41 = vpop.permute.xlu1 %66  ;;  %v145_v62 = vmul.f32 %v142_v57, %v88_v59 }
  0x9a   :  { %v135_v45 = vmul.f32 %v134_v35, %v67_v41  ;;  %v140_v60 = vadd.f32 %v137_v54, %v133_v56 }
  0x9b   :  { %v149_v2 = vsel %vm147_vm0, %v145_v62, 0.0 }
  0x9c   :  { %v138_v52 = vadd.f32 %v135_v45, %v131_v48  ;;  %v143_v0 = vmax.f32 %v140_v60, 0.0 }
  0x9e   :  { %v141_v58 = vmax.f32 %v138_v52, 0.0 }
  0xa2   :  { %v83_v55 = vpop.permute.xlu1 %82 }
  0xa3   :  { %v144_v61 = vmul.f32 %v141_v58, %v83_v55 }
  0xa5   :  { %v148_v63 = vsel %vm147_vm0, %v144_v61, 0.0 }
  0xa6   :  { %v150_v4 = vadd.f32 %v149_v2, %v148_v63 }
  0xaa   :  { %v93_v1 = vpop.permute.xlu1 %92 }
  0xab   :  { %v146_v3 = vmul.f32 %v143_v0, %v93_v1 }
  0xad   :  { %v152_v5 = vsel %vm151_vm1, %v146_v3, 0.0 }
  0xae   :  { %v153_v6 = vadd.f32 %v152_v5, %v150_v4 }
  0xb0   :  { %v154_v7 = vrot.slane %v153_v6, 4 }
  0xb2   :  { %v155_v8 = vadd.f32 %v154_v7, %v153_v6 }
  0xb4   :  { %v156_v9 = vrot.slane %v155_v8, 2 }
  0xb6   :  { %v157_v10 = vadd.f32 %v156_v9, %v155_v8 }
  0xb8   :  { %v158_v11 = vrot.slane %v157_v10, 1 }
  0xba   :  { %v159_v13 = vadd.f32 %v158_v11, %v157_v10 }
  0xbc   :  { %v162_v14 = vadd.f32 %v161_v12, %v159_v13 }
  0xbe   :  { %164 = vst.msk [vmem:[#allocation3] sm:$0x1] %vm163_vm2, %v162_v14 }
  0xbf   :  { %175 = dma.vmem_to_hbm [thread:$0]  %s171_s12, 16, %s173_s15, [#allocation4]  }
  0xc0   :  { %224 = dma.done.wait [#allocation4], 16  }
  0xc1   :  { %225 = vsyncadd [#allocation4], 4294967280 }
  0xc2   :  { %180 = vsyncpa [#allocation4], 1 }

</bundles_post_ra>
